<compile_context>
chip_gen: v5e
topology: v5e:2x2
jax: 0.10.0
libtpu: 0.0.40
codegen_flags: <defaults>
</compile_context>

<pallas_src>
import functools

import jax
import jax.numpy as jnp
from jax.experimental import pallas as pl
from jax.experimental.pallas import tpu as pltpu

NEG_SLOPE = 0.01  # PyTorch nn.LeakyReLU default negative_slope

D_IN = 784    # input features
H_RAW = 200   # logical hidden size
O_RAW = 10    # logical output size
H_PAD = 256   # hidden padded to a lane-dense multiple of 128
O_PAD = 128   # output padded to a lane-dense multiple of 128

TB_MAX = 512    # batch-tile upper bound (big DMAs, still a few MiB of VMEM)
TB_SPLIT = 256  # only split into >=2 grid steps if each tile keeps >=256 rows


def _round_up(x, m):
    return ((x + m - 1) // m) * m


def _leaky_relu(x):
    return jnp.where(x > 0, x, NEG_SLOPE * x)


def _default_eltwise_dtype():
    """bf16 epilogues on chips with a bf16 VPU (v6e/v7x); f32 on v2-v5."""
    try:
        kind = jax.devices()[0].device_kind.lower()
    except Exception:  # pragma: no cover - conservative fallback
        return jnp.float32
    if any(tag in kind for tag in ("v2", "v3", "v4", "v5")):
        return jnp.float32
    return jnp.bfloat16


def mlp_kernel(x_ref, w1_ref, b1_ref, w2_ref, b2_ref, w3_ref, b3_ref, o_ref,
               *, eltwise_dtype):
    # Cast x f32 -> bf16 in-kernel (avoids a separate wrapper HBM pad/cast pass).
    x = x_ref[...].astype(jnp.bfloat16)

    # Layer 1: [tb,784] @ [784,256], f32 MXU accumulation.
    h = jnp.dot(x, w1_ref[...], preferred_element_type=jnp.float32)
    h = _leaky_relu(h.astype(eltwise_dtype) + b1_ref[...])

    # Layer 2: [tb,256] @ [256,256]
    h = jnp.dot(h.astype(jnp.bfloat16), w2_ref[...],
                preferred_element_type=jnp.float32)
    h = _leaky_relu(h.astype(eltwise_dtype) + b2_ref[...])

    # Layer 3: [tb,256] @ [256,128]  (cols 10..127 are zero-padded weights)
    h = jnp.dot(h.astype(jnp.bfloat16), w3_ref[...],
                preferred_element_type=jnp.float32)
    o_ref[...] = _leaky_relu(h.astype(eltwise_dtype) + b3_ref[...]).astype(o_ref.dtype)


def _pad_params(params, eltwise_dtype):
    """Zero-pad weights/biases to lane-dense shapes; weights cast to bf16."""
    w1, b1, w2, b2, w3, b3 = params
    w1p = jnp.zeros((D_IN, H_PAD), jnp.bfloat16).at[:, :H_RAW].set(
        w1.astype(jnp.bfloat16))
    b1p = jnp.zeros((1, H_PAD), eltwise_dtype).at[:, :H_RAW].set(
        b1.astype(eltwise_dtype))
    w2p = jnp.zeros((H_PAD, H_PAD), jnp.bfloat16).at[:H_RAW, :H_RAW].set(
        w2.astype(jnp.bfloat16))
    b2p = jnp.zeros((1, H_PAD), eltwise_dtype).at[:, :H_RAW].set(
        b2.astype(eltwise_dtype))
    w3p = jnp.zeros((H_PAD, O_PAD), jnp.bfloat16).at[:H_RAW, :O_RAW].set(
        w3.astype(jnp.bfloat16))
    b3p = jnp.zeros((1, O_PAD), eltwise_dtype).at[:, :O_RAW].set(
        b3.astype(eltwise_dtype))
    return w1p, b1p, w2p, b2p, w3p, b3p


def _select_tb(B):
    """Adaptive batch tile.

    * Small batches: one exact-size tile (round_up(B, 8) rows) -> no wasted
      DMA or compute on padding rows.
    * Larger batches: >= 2 grid steps (so v7x's 2 TensorCores both get work),
      tiles of up to TB_MAX rows. Non-full tiles are rounded to 16 rows so
      the bf16 output block satisfies sublane tiling on every generation.
    """
    bp8 = _round_up(max(B, 1), 8)
    if bp8 < 2 * TB_SPLIT:
        return bp8                        # single tile == full (padded) batch dim
    return min(TB_MAX, _round_up(pl.cdiv(bp8, 2), 16))


def mlp_forward(x, params, *, eltwise_dtype=None):
    B = x.shape[0]
    if eltwise_dtype is None:
        eltwise_dtype = _default_eltwise_dtype()
    w1p, b1p, w2p, b2p, w3p, b3p = _pad_params(params, eltwise_dtype)

    tb = _select_tb(B)
    grid = pl.cdiv(B, tb)
    Bp = grid * tb
    if Bp != B:
        # Minimal zero-pad so the grid divides evenly (no dtype cast here; the
        # bf16 cast happens inside the kernel). Padded rows are independent of
        # real rows and sliced off below.
        x = jnp.pad(x, ((0, Bp - B), (0, 0)))

    kernel = functools.partial(mlp_kernel, eltwise_dtype=eltwise_dtype)
    out = pl.pallas_call(
        kernel,
        out_shape=jax.ShapeDtypeStruct((Bp, O_PAD), jnp.bfloat16),
        grid_spec=pltpu.PrefetchScalarGridSpec(
            num_scalar_prefetch=0,
            grid=(grid,),
            in_specs=[
                # x: tiled over the batch grid axis (double-buffered by Pallas).
                pl.BlockSpec((tb, D_IN), lambda i: (i, 0)),
                # Weights/biases: constant index_map -> resident across steps.
                pl.BlockSpec((D_IN, H_PAD), lambda i: (0, 0)),
                pl.BlockSpec((1, H_PAD), lambda i: (0, 0)),
                pl.BlockSpec((H_PAD, H_PAD), lambda i: (0, 0)),
                pl.BlockSpec((1, H_PAD), lambda i: (0, 0)),
                pl.BlockSpec((H_PAD, O_PAD), lambda i: (0, 0)),
                pl.BlockSpec((1, O_PAD), lambda i: (0, 0)),
            ],
            out_specs=pl.BlockSpec((tb, O_PAD), lambda i: (i, 0)),
        ),
        compiler_params=pltpu.CompilerParams(
            dimension_semantics=("parallel",),
        ),
    )(x, w1p, b1p, w2p, b2p, w3p, b3p)

    # Slice away batch padding and lane padding (128 -> 10); upcast to f32 to
    # match the PyTorch module's output dtype.
    return out[:B, :O_RAW].astype(jnp.float32)


def mlp_reference(x, params, eltwise_dtype=jnp.float32):
    """Pure-JAX reference mirroring the kernel's bf16-matmul numerics."""
    w1, b1, w2, b2, w3, b3 = params

    def layer(h, w, b):
        h = jnp.dot(h.astype(jnp.bfloat16), w.astype(jnp.bfloat16),
                    preferred_element_type=jnp.float32)
        return _leaky_relu(h.astype(eltwise_dtype) + b.astype(eltwise_dtype))

    h = layer(x, w1, b1)
    h = layer(h, w2, b2)
    h = layer(h, w3, b3)
    return h.astype(jnp.float32)


def init_params(key):
    """Deterministic init mirroring PyTorch Linear (uniform +/- 1/sqrt(fan_in)).

    Weights are stored as [in_features, out_features] (transposed vs. PyTorch),
    biases as [1, out_features].
    """
    dims = [(D_IN, H_RAW), (H_RAW, H_RAW), (H_RAW, O_RAW)]
    params = []
    for fan_in, fan_out in dims:
        key, kw, kb = jax.random.split(key, 3)
        bound = 1.0 / jnp.sqrt(fan_in)
        w = jax.random.uniform(kw, (fan_in, fan_out), jnp.float32, -bound, bound)
        b = jax.random.uniform(kb, (1, fan_out), jnp.float32, -bound, bound)
        params.extend([w, b])
    return tuple(params)


if __name__ == "__main__":
    key = jax.random.PRNGKey(0)
    key, kx = jax.random.split(key)
    params = init_params(key)

    B = 8  # small batch; kernel uses one exact-size 8-row tile (no padding)
    x = jax.random.normal(kx, (B, D_IN), jnp.float32)

    edt = _default_eltwise_dtype()
    out = mlp_forward(x, params, eltwise_dtype=edt)
    jax.block_until_ready(out)

    ref = mlp_reference(x, params, eltwise_dtype=edt)
    assert out.shape == (B, O_RAW)
    assert jnp.allclose(out, ref, atol=1e-2, rtol=1e-2), "mismatch vs reference"

    print("KERNEL_OK")
</pallas_src>

<mosaic_0001>
module attributes {stable_mosaic.version = 11 : i64} {
  func.func @mlp_kernel(%arg0: i32, %arg1: memref<8x784xf32, #tpu.memory_space<vmem>>, %arg2: memref<784x256xbf16, #tpu.memory_space<vmem>>, %arg3: memref<1x256xbf16, #tpu.memory_space<vmem>>, %arg4: memref<256x256xbf16, #tpu.memory_space<vmem>>, %arg5: memref<1x256xbf16, #tpu.memory_space<vmem>>, %arg6: memref<256x128xbf16, #tpu.memory_space<vmem>>, %arg7: memref<1x128xbf16, #tpu.memory_space<vmem>>, %arg8: memref<8x128xbf16, #tpu.memory_space<vmem>>) attributes {dimension_semantics = [#tpu.dimension_semantics<parallel>], iteration_bounds = array<i64: 1>, scalar_prefetch = 0 : i64, scratch_operands = 0 : i64, tpu.core_type = #tpu.core_type<tc>, window_params = [{transform_indices = @transform_0, window_bounds = array<i64: 8, 784>}, {pipeline_mode = #tpu.pipeline_mode<synchronous>, transform_indices = @transform_1, window_bounds = array<i64: 784, 256>}, {pipeline_mode = #tpu.pipeline_mode<synchronous>, transform_indices = @transform_2, window_bounds = array<i64: 1, 256>}, {pipeline_mode = #tpu.pipeline_mode<synchronous>, transform_indices = @transform_3, window_bounds = array<i64: 256, 256>}, {pipeline_mode = #tpu.pipeline_mode<synchronous>, transform_indices = @transform_4, window_bounds = array<i64: 1, 256>}, {pipeline_mode = #tpu.pipeline_mode<synchronous>, transform_indices = @transform_5, window_bounds = array<i64: 256, 128>}, {pipeline_mode = #tpu.pipeline_mode<synchronous>, transform_indices = @transform_6, window_bounds = array<i64: 1, 128>}, {transform_indices = @transform_7, window_bounds = array<i64: 8, 128>}]} {
    %c0 = arith.constant 0 : index
    %c0_0 = arith.constant 0 : index
    %0 = vector.load %arg1[%c0, %c0_0] : memref<8x784xf32, #tpu.memory_space<vmem>>, vector<8x784xf32>
    %1 = arith.truncf %0 : vector<8x784xf32> to vector<8x784xbf16>
    %c0_1 = arith.constant 0 : index
    %c0_2 = arith.constant 0 : index
    %2 = vector.load %arg2[%c0_1, %c0_2] : memref<784x256xbf16, #tpu.memory_space<vmem>>, vector<784x256xbf16>
    %cst = arith.constant dense<0.000000e+00> : vector<8x256xf32>
    %3 = tpu.matmul %1, %2, %cst {dimension_numbers = #tpu.dot_dimension_numbers<[1], [0], [0], [1], [0, 0, 1, 1], [], []>} : vector<8x784xbf16>, vector<784x256xbf16>, vector<8x256xf32> -> vector<8x256xf32>
    %4 = arith.truncf %3 : vector<8x256xf32> to vector<8x256xbf16>
    %c0_3 = arith.constant 0 : index
    %c0_4 = arith.constant 0 : index
    %5 = vector.load %arg3[%c0_3, %c0_4] : memref<1x256xbf16, #tpu.memory_space<vmem>>, vector<1x256xbf16>
    %6 = vector.broadcast %5 : vector<1x256xbf16> to vector<8x256xbf16>
    %7 = arith.addf %4, %6 : vector<8x256xbf16>
    %cst_5 = arith.constant 0.000000e+00 : bf16
    %8 = vector.broadcast %cst_5 : bf16 to vector<8x256xbf16>
    %9 = arith.cmpf ogt, %7, %8 : vector<8x256xbf16>
    %cst_6 = arith.constant 1.000980e-02 : bf16
    %10 = vector.broadcast %cst_6 : bf16 to vector<8x256xbf16>
    %11 = arith.mulf %10, %7 : vector<8x256xbf16>
    %12 = arith.select %9, %7, %11 : vector<8x256xi1>, vector<8x256xbf16>
    %c0_7 = arith.constant 0 : index
    %c0_8 = arith.constant 0 : index
    %13 = vector.load %arg4[%c0_7, %c0_8] : memref<256x256xbf16, #tpu.memory_space<vmem>>, vector<256x256xbf16>
    %cst_9 = arith.constant dense<0.000000e+00> : vector<8x256xf32>
    %14 = tpu.matmul %12, %13, %cst_9 {dimension_numbers = #tpu.dot_dimension_numbers<[1], [0], [0], [1], [0, 0, 1, 1], [], []>} : vector<8x256xbf16>, vector<256x256xbf16>, vector<8x256xf32> -> vector<8x256xf32>
    %15 = arith.truncf %14 : vector<8x256xf32> to vector<8x256xbf16>
    %c0_10 = arith.constant 0 : index
    %c0_11 = arith.constant 0 : index
    %16 = vector.load %arg5[%c0_10, %c0_11] : memref<1x256xbf16, #tpu.memory_space<vmem>>, vector<1x256xbf16>
    %17 = vector.broadcast %16 : vector<1x256xbf16> to vector<8x256xbf16>
    %18 = arith.addf %15, %17 : vector<8x256xbf16>
    %cst_12 = arith.constant 0.000000e+00 : bf16
    %19 = vector.broadcast %cst_12 : bf16 to vector<8x256xbf16>
    %20 = arith.cmpf ogt, %18, %19 : vector<8x256xbf16>
    %cst_13 = arith.constant 1.000980e-02 : bf16
    %21 = vector.broadcast %cst_13 : bf16 to vector<8x256xbf16>
    %22 = arith.mulf %21, %18 : vector<8x256xbf16>
    %23 = arith.select %20, %18, %22 : vector<8x256xi1>, vector<8x256xbf16>
    %c0_14 = arith.constant 0 : index
    %c0_15 = arith.constant 0 : index
    %24 = vector.load %arg6[%c0_14, %c0_15] : memref<256x128xbf16, #tpu.memory_space<vmem>>, vector<256x128xbf16>
    %cst_16 = arith.constant dense<0.000000e+00> : vector<8x128xf32>
    %25 = tpu.matmul %23, %24, %cst_16 {dimension_numbers = #tpu.dot_dimension_numbers<[1], [0], [0], [1], [0, 0, 1, 1], [], []>} : vector<8x256xbf16>, vector<256x128xbf16>, vector<8x128xf32> -> vector<8x128xf32>
    %26 = arith.truncf %25 : vector<8x128xf32> to vector<8x128xbf16>
    %c0_17 = arith.constant 0 : index
    %c0_18 = arith.constant 0 : index
    %27 = vector.load %arg7[%c0_17, %c0_18] : memref<1x128xbf16, #tpu.memory_space<vmem>>, vector<1x128xbf16>
    %28 = vector.broadcast %27 : vector<1x128xbf16> to vector<8x128xbf16>
    %29 = arith.addf %26, %28 : vector<8x128xbf16>
    %cst_19 = arith.constant 0.000000e+00 : bf16
    %30 = vector.broadcast %cst_19 : bf16 to vector<8x128xbf16>
    %31 = arith.cmpf ogt, %29, %30 : vector<8x128xbf16>
    %cst_20 = arith.constant 1.000980e-02 : bf16
    %32 = vector.broadcast %cst_20 : bf16 to vector<8x128xbf16>
    %33 = arith.mulf %32, %29 : vector<8x128xbf16>
    %34 = arith.select %31, %29, %33 : vector<8x128xi1>, vector<8x128xbf16>
    %c0_21 = arith.constant 0 : index
    %c0_22 = arith.constant 0 : index
    %35 = vector.load %arg8[%c0_21, %c0_22] : memref<8x128xbf16, #tpu.memory_space<vmem>>, vector<8x128xbf16>
    tpu.vector_store %arg8[%c0_21, %c0_22], %34 {strides = array<i32>} : memref<8x128xbf16, #tpu.memory_space<vmem>>, vector<8x128xbf16>,
    return
  }
  func.func @transform_0(%arg0: i32) -> (i32, i32) {
    %c0_i32 = arith.constant 0 : i32
    %c0_i32_0 = arith.constant 0 : i32
    return %arg0, %c0_i32 : i32, i32
  }
  func.func @transform_1(%arg0: i32) -> (i32, i32) {
    %c0_i32 = arith.constant 0 : i32
    %c0_i32_0 = arith.constant 0 : i32
    %c0_i32_1 = arith.constant 0 : i32
    return %c0_i32, %c0_i32_0 : i32, i32
  }
  func.func @transform_2(%arg0: i32) -> (i32, i32) {
    %c0_i32 = arith.constant 0 : i32
    %c0_i32_0 = arith.constant 0 : i32
    %c0_i32_1 = arith.constant 0 : i32
    return %c0_i32, %c0_i32_0 : i32, i32
  }
  func.func @transform_3(%arg0: i32) -> (i32, i32) {
    %c0_i32 = arith.constant 0 : i32
    %c0_i32_0 = arith.constant 0 : i32
    %c0_i32_1 = arith.constant 0 : i32
    return %c0_i32, %c0_i32_0 : i32, i32
  }
  func.func @transform_4(%arg0: i32) -> (i32, i32) {
    %c0_i32 = arith.constant 0 : i32
    %c0_i32_0 = arith.constant 0 : i32
    %c0_i32_1 = arith.constant 0 : i32
    return %c0_i32, %c0_i32_0 : i32, i32
  }
  func.func @transform_5(%arg0: i32) -> (i32, i32) {
    %c0_i32 = arith.constant 0 : i32
    %c0_i32_0 = arith.constant 0 : i32
    %c0_i32_1 = arith.constant 0 : i32
    return %c0_i32, %c0_i32_0 : i32, i32
  }
  func.func @transform_6(%arg0: i32) -> (i32, i32) {
    %c0_i32 = arith.constant 0 : i32
    %c0_i32_0 = arith.constant 0 : i32
    %c0_i32_1 = arith.constant 0 : i32
    return %c0_i32, %c0_i32_0 : i32, i32
  }
  func.func @transform_7(%arg0: i32) -> (i32, i32) {
    %c0_i32 = arith.constant 0 : i32
    %c0_i32_0 = arith.constant 0 : i32
    return %arg0, %c0_i32 : i32, i32
  }
}

</mosaic_0001>

<bundles_post_ra>
// kernel: tpu_custom_call.1
= control target key start
LH: loop header
LB: loop body
LE: loop exit
PB: predicated region body
PF: predicated region fallthrough
CT: control target
= control target key end

     0   :  { %12 = vsyncpa [#allocation3], 0  ;;  %s2427_s0 = inlined_call_operand.hbm [shape: f32[8,784], index: 0, kind: input, shape index: {}]   ;;  %s2428_s1 = inlined_call_operand.hbm [shape: bf16[784,256], index: 1, kind: input, shape index: {}]   ;;  %s2429_s2 = inlined_call_operand.hbm [shape: bf16[1,256], index: 2, kind: input, shape index: {}]   ;;  %s2430_s3 = inlined_call_operand.hbm [shape: bf16[256,256], index: 3, kind: input, shape index: {}]   ;;  %s2431_s4 = inlined_call_operand.vmem [shape: bf16[1,256], index: 4, kind: input, shape index: {}]   ;;  %s2432_s5 = inlined_call_operand.hbm [shape: bf16[256,128], index: 5, kind: input, shape index: {}]   ;;  %s2433_s6 = inlined_call_operand.vmem [shape: bf16[1,128], index: 6, kind: input, shape index: {}]   ;;  %s2434_s7 = inlined_call_operand.hbm [shape: bf16[8,128], index: 7, kind: output, shape index: {}]  }
   0x1   :  { %13 = vsyncpa [#allocation6], 0 }
   0x2   :  { %14 = vsyncpa [#allocation9], 0  ;;  %s31_s26 = sshll.u32 %s2428_s1, 4  ;;  %s32_s26 = int_to_ptr.hbm [resolvable:$true] %s31_s26 }
   0x3   :  { %15 = vsyncpa [#allocation4], 0  ;;  %s2288_s27 = smov [#allocation5]   ;;  %s55_s8 = sshll.u32 %s2430_s3, 4  ;;  %s56_s8 = int_to_ptr.hbm [resolvable:$true] %s55_s8 }
   0x4   :  { %s33_s28 = sshll.u32 %s2288_s27, 4  ;;  %s2289_s9 = smov 128   ;;  %s34_s28 = int_to_ptr.vmem [resolvable:$true] %s33_s28 }
   0x5   :  { %s2290_s10 = smov 8   ;;  %s2291_s11 = smov [#allocation8]  }
   0x6   :  { %39 = dma.hbm_to_vmem [thread:$0]  %s32_s26, 12544, %s34_s28, [#allocation6], %s2289_s9, %s2289_s9, %s2290_s10  }
   0x7   :  { %s57_s12 = sshll.u32 %s2291_s11, 4  ;;  %s21_s15 = sshll.u32 %s2427_s0, 4  ;;  %s58_s12 = int_to_ptr.vmem [resolvable:$true] %s57_s12  ;;  %s22_s15 = int_to_ptr.hbm [resolvable:$true] %s21_s15 }
   0x8   :  { %63 = dma.hbm_to_vmem [thread:$0]  %s56_s8, 4096, %s58_s12, [#allocation9], %s2289_s9, %s2289_s9, %s2290_s10  }
   0x9   :  { %s45_s17 = sshll.u32 %s2429_s2, 4  ;;  %s2292_s18 = smov [#allocation2]   ;;  %s46_s17 = int_to_ptr.hbm [resolvable:$true] %s45_s17 }
   0xa   :  { %s23_s19 = sshll.u32 %s2292_s18, 4  ;;  %s2293_s3 = smov [#allocation7]   ;;  %s24_s19 = int_to_ptr.vmem [resolvable:$true] %s23_s19 }
   0xb   :  { %26 = dma.hbm_to_vmem [thread:$0]  %s22_s15, 896, %s24_s19, [#allocation3]  }
   0xc   :  { %s47_s20 = sshll.u32 %s2293_s3, 4  ;;  %s70_s23 = sshll.u32 %s2432_s5, 4  ;;  %s48_s20 = int_to_ptr.vmem [resolvable:$true] %s47_s20  ;;  %s71_s23 = int_to_ptr.hbm [resolvable:$true] %s70_s23 }
   0xd   :  { %50 = dma.hbm_to_vmem [thread:$0]  %s46_s17, 32, %s48_s20, [#allocation6]  }
   0xe   :  { %s2294_s0 = smov [#allocation10]   ;;  %s2295_s25 = smov 64  }
   0xf   :  { %s72_s24 = sshll.u32 %s2294_s0, 4  ;;  %s2296_s26 = smov 4   ;;  %s73_s24 = int_to_ptr.vmem [resolvable:$true] %s72_s24 }
  0x10   :  { %78 = dma.hbm_to_vmem [thread:$0]  %s71_s23, 2048, %s73_s24, [#allocation9], %s2295_s25, %s2295_s25, %s2296_s26  }
  0x11   :  { %2280 = dma.done.wait [#allocation3], 896  }
  0x12   :  { %2281 = vsyncadd [#allocation3], 4294966400 }
  0x13   :  { %2282 = dma.done.wait [#allocation6], 12576  }
  0x14   :  { %2283 = vsyncadd [#allocation6], 4294954720 }
  0x15   :  { %2284 = dma.done.wait [#allocation9], 6144  }
  0x16   :  { %2285 = vsyncadd [#allocation9], 4294961152  ;;  %v1452_v0 = vld [vmem:[#allocation5 + $0x70] sm:$0xf]  ;;  %v1995_v1 = vld [vmem:[#allocation5 + $0x74] sm:$0xf0] }
  0x17   :  { %v1580_v2 = vld [vmem:[#allocation5 + $0x170] sm:$0xf]  ;;  %v1453_v3 = vor.u32 %v1995_v1, %v1452_v0  ;;  %v2027_v4 = vld [vmem:[#allocation5 + $0x174] sm:$0xf0]  ;;  %v1444_v11 = vld [vmem:[#allocation5 + $0x60] sm:$0xf] }
  0x18   :  { %v1644_v5 = vld [vmem:[#allocation5 + $0x1f0] sm:$0xf]  ;;  %v2043_v6 = vld [vmem:[#allocation5 + $0x1f4] sm:$0xf0]  ;;  %v1581_v7 = vor.u32 %v2027_v4, %v1580_v2  ;;  %v1993_v13 = vld [vmem:[#allocation5 + $0x64] sm:$0xf0] }
  0x19   :  { %v1645_v8 = vor.u32 %v2043_v6, %v1644_v5  ;;  %v1516_v9 = vld [vmem:[#allocation5 + $0xf0] sm:$0xf]  ;;  %v2011_v10 = vld [vmem:[#allocation5 + $0xf4] sm:$0xf0]  ;;  %708 = vmatpush.bf16.msra.mxu0 %v1453_v3  ;;  %v1572_v14 = vld [vmem:[#allocation5 + $0x160] sm:$0xf]  ;;  %v1445_v16 = vor.u32 %v1993_v13, %v1444_v11 }
  0x1a   :  { %v1517_v12 = vor.u32 %v2011_v10, %v1516_v9  ;;  %v2025_v15 = vld [vmem:[#allocation5 + $0x164] sm:$0xf0]  ;;  %734 = vmatpush.bf16.msra.mxu2 %v1581_v7  ;;  %v1636_v18 = vld [vmem:[#allocation5 + $0x1e0] sm:$0xf]  ;;  %v1436_v23 = vld [vmem:[#allocation5 + $0x50] sm:$0xf] }
  0x1b   :  { %747 = vmatpush.bf16.msra.mxu3 %v1645_v8  ;;  %v1573_v17 = vor.u32 %v2025_v15, %v1572_v14  ;;  %v2041_v19 = vld [vmem:[#allocation5 + $0x1e4] sm:$0xf0]  ;;  %v1508_v20 = vld [vmem:[#allocation5 + $0xe0] sm:$0xf]  ;;  %v1991_v24 = vld [vmem:[#allocation5 + $0x54] sm:$0xf0] }
  0x1c   :  { %721 = vmatpush.bf16.msra.mxu1 %v1517_v12  ;;  %v1637_v21 = vor.u32 %v2041_v19, %v1636_v18  ;;  %v2009_v22 = vld [vmem:[#allocation5 + $0xe4] sm:$0xf0]  ;;  %v1564_v26 = vld [vmem:[#allocation5 + $0x150] sm:$0xf]  ;;  %v2023_v27 = vld [vmem:[#allocation5 + $0x154] sm:$0xf0]  ;;  %v1437_v29 = vor.u32 %v1991_v24, %v1436_v23 }
  0x1d   :  { %v1509_v25 = vor.u32 %v2009_v22, %v1508_v20  ;;  %v1628_v28 = vld [vmem:[#allocation5 + $0x1d0] sm:$0xf]  ;;  %709 = vmatpush.bf16.msra.mxu0 %v1445_v16  ;;  %v2039_v30 = vld [vmem:[#allocation5 + $0x1d4] sm:$0xf0]  ;;  %v1565_v33 = vor.u32 %v2023_v27, %v1564_v26  ;;  %v1428_v35 = vld [vmem:[#allocation5 + $0x40] sm:$0xf] }
  0x1e   :  { %v1500_v31 = vld [vmem:[#allocation5 + $0xd0] sm:$0xf]  ;;  %v2007_v32 = vld [vmem:[#allocation5 + $0xd4] sm:$0xf0]  ;;  %735 = vmatpush.bf16.msra.mxu2 %v1573_v17  ;;  %v1629_v34 = vor.u32 %v2039_v30, %v1628_v28  ;;  %v1989_v36 = vld [vmem:[#allocation5 + $0x44] sm:$0xf0] }
  0x1f   :  { %748 = vmatpush.bf16.msra.mxu3 %v1637_v21  ;;  %v1556_v37 = vld [vmem:[#allocation5 + $0x140] sm:$0xf]  ;;  %v1501_v38 = vor.u32 %v2007_v32, %v1500_v31  ;;  %v2021_v39 = vld [vmem:[#allocation5 + $0x144] sm:$0xf0]  ;;  %v1429_v44 = vor.u32 %v1989_v36, %v1428_v35  ;;  %v1420_v47 = vld [vmem:[#allocation5 + $0x30] sm:$0xf] }
  0x20   :  { %722 = vmatpush.bf16.msra.mxu1 %v1509_v25  ;;  %v1620_v40 = vld [vmem:[#allocation5 + $0x1c0] sm:$0xf]  ;;  %v2037_v41 = vld [vmem:[#allocation5 + $0x1c4] sm:$0xf0]  ;;  %v1557_v45 = vor.u32 %v2021_v39, %v1556_v37  ;;  %v1987_v48 = vld [vmem:[#allocation5 + $0x34] sm:$0xf0] }
  0x21   :  { %v1492_v42 = vld [vmem:[#allocation5 + $0xc0] sm:$0xf]  ;;  %v2005_v43 = vld [vmem:[#allocation5 + $0xc4] sm:$0xf0]  ;;  %710 = vmatpush.bf16.msra.mxu0 %v1437_v29  ;;  %v1621_v46 = vor.u32 %v2037_v41, %v1620_v40  ;;  %v1548_v49 = vld [vmem:[#allocation5 + $0x130] sm:$0xf]  ;;  %v1421_v56 = vor.u32 %v1987_v48, %v1420_v47 }
  0x22   :  { %736 = vmatpush.bf16.msra.mxu2 %v1565_v33  ;;  %v1493_v50 = vor.u32 %v2005_v43, %v1492_v42  ;;  %v2019_v51 = vld [vmem:[#allocation5 + $0x134] sm:$0xf0]  ;;  %v1612_v52 = vld [vmem:[#allocation5 + $0x1b0] sm:$0xf]  ;;  %v1412_v59 = vld [vmem:[#allocation5 + $0x20] sm:$0xf] }
  0x23   :  { %749 = vmatpush.bf16.msra.mxu3 %v1629_v34  ;;  %v2035_v53 = vld [vmem:[#allocation5 + $0x1b4] sm:$0xf0]  ;;  %v1484_v54 = vld [vmem:[#allocation5 + $0xb0] sm:$0xf]  ;;  %v1549_v57 = vor.u32 %v2019_v51, %v1548_v49  ;;  %v1985_v60 = vld [vmem:[#allocation5 + $0x24] sm:$0xf0] }
  0x24   :  { %723 = vmatpush.bf16.msra.mxu1 %v1501_v38  ;;  %v2003_v55 = vld [vmem:[#allocation5 + $0xb4] sm:$0xf0]  ;;  %v1613_v58 = vor.u32 %v2035_v53, %v1612_v52  ;;  %v1540_v61 = vld [vmem:[#allocation5 + $0x120] sm:$0xf]  ;;  %v2017_v63 = vld [vmem:[#allocation5 + $0x124] sm:$0xf0]  ;;  %v1413_v4 = vor.u32 %v1985_v60, %v1412_v59 }
  0x25   :  { %711 = vmatpush.bf16.msra.mxu0 %v1429_v44  ;;  %v1485_v62 = vor.u32 %v2003_v55, %v1484_v54  ;;  %v1604_v0 = vld [vmem:[#allocation5 + $0x1a0] sm:$0xf]  ;;  %v2033_v1 = vld [vmem:[#allocation5 + $0x1a4] sm:$0xf0]  ;;  %v1541_v5 = vor.u32 %v2017_v63, %v1540_v61  ;;  %v1404_v7 = vld [vmem:[#allocation5 + $0x10] sm:$0xf] }
  0x26   :  { %737 = vmatpush.bf16.msra.mxu2 %v1557_v45  ;;  %v1476_v2 = vld [vmem:[#allocation5 + $0xa0] sm:$0xf]  ;;  %v2001_v3 = vld [vmem:[#allocation5 + $0xa4] sm:$0xf0]  ;;  %v1605_v6 = vor.u32 %v2033_v1, %v1604_v0  ;;  %v1983_v8 = vld [vmem:[#allocation5 + $0x14] sm:$0xf0] }
  0x27   :  { %750 = vmatpush.bf16.msra.mxu3 %v1621_v46  ;;  %v1532_v9 = vld [vmem:[#allocation5 + $0x110] sm:$0xf]  ;;  %v1477_v10 = vor.u32 %v2001_v3, %v1476_v2  ;;  %v2015_v11 = vld [vmem:[#allocation5 + $0x114] sm:$0xf0]  ;;  %v1405_v16 = vor.u32 %v1983_v8, %v1404_v7  ;;  %v1396_v17 = vld [vmem:[#allocation5] sm:$0xf] }
  0x28   :  { %724 = vmatpush.bf16.msra.mxu1 %v1493_v50  ;;  %v1596_v12 = vld [vmem:[#allocation5 + $0x190] sm:$0xf]  ;;  %v2031_v13 = vld [vmem:[#allocation5 + $0x194] sm:$0xf0]  ;;  %v1981_v18 = vld [vmem:[#allocation5 + $0x4] sm:$0xf0]  ;;  %v1533_v20 = vor.u32 %v2015_v11, %v1532_v9 }
  0x29   :  { %712 = vmatpush.bf16.msra.mxu0 %v1421_v56  ;;  %v1468_v14 = vld [vmem:[#allocation5 + $0x90] sm:$0xf]  ;;  %v1999_v15 = vld [vmem:[#allocation5 + $0x94] sm:$0xf0]  ;;  %v1524_v19 = vld [vmem:[#allocation5 + $0x100] sm:$0xf]  ;;  %v1597_v21 = vor.u32 %v2031_v13, %v1596_v12  ;;  %v1397_v32 = vor.u32 %v1981_v18, %v1396_v17 }
  0x2a   :  { %738 = vmatpush.bf16.msra.mxu2 %v1549_v57  ;;  %v2013_v22 = vld [vmem:[#allocation5 + $0x104] sm:$0xf0]  ;;  %v1588_v23 = vld [vmem:[#allocation5 + $0x180] sm:$0xf]  ;;  %v1469_v25 = vor.u32 %v1999_v15, %v1468_v14  ;;  %v1708_v26 = vld [vmem:[#allocation5 + $0x270] sm:$0xf] }
  0x2b   :  { %751 = vmatpush.bf16.msra.mxu3 %v1613_v58  ;;  %v2029_v24 = vld [vmem:[#allocation5 + $0x184] sm:$0xf0]  ;;  %v2059_v27 = vld [vmem:[#allocation5 + $0x274] sm:$0xf0]  ;;  %v1994_v28 = vld [vmem:[#allocation5 + $0x74] sm:$0xf]  ;;  %v1525_v36 = vor.u32 %v2013_v22, %v1524_v19 }
  0x2c   :  { %725 = vmatpush.bf16.msra.mxu1 %v1485_v62  ;;  %v1454_v29 = vld [vmem:[#allocation5 + $0x78] sm:$0xf0]  ;;  %v1460_v30 = vld [vmem:[#allocation5 + $0x80] sm:$0xf]  ;;  %v1997_v31 = vld [vmem:[#allocation5 + $0x84] sm:$0xf0]  ;;  %v1589_v37 = vor.u32 %v2029_v24, %v1588_v23  ;;  %v1709_v41 = vor.u32 %v2059_v27, %v1708_v26 }
  0x2d   :  { %713 = vmatpush.bf16.msra.mxu0 %v1413_v4  ;;  %v104_v33 = vld [vmem:[#allocation2 + $0x10] sm:$0xff]  ;;  %v1780_v34 = vld [vmem:[#allocation5 + $0x300] sm:$0xf]  ;;  %v2077_v35 = vld [vmem:[#allocation5 + $0x304] sm:$0xf0]  ;;  %v1457_v42 = vor.u32 %v1994_v28, %v1454_v29  ;;  %v1461_v46 = vor.u32 %v1997_v31, %v1460_v30  ;;  %vm704_vm0 = vcmask 130048  }
  0x2e   :  { %739 = vmatpush.bf16.msra.mxu2 %v1541_v5  ;;  %v1772_v38 = vld [vmem:[#allocation5 + $0x2f0] sm:$0xf]  ;;  %v2075_v39 = vld [vmem:[#allocation5 + $0x2f4] sm:$0xf0]  ;;  %v2010_v40 = vld [vmem:[#allocation5 + $0xf4] sm:$0xf]  ;;  %v1781_v47 = vor.u32 %v2077_v35, %v1780_v34  ;;  %v2353_v51 = vpack.c.bf16 %v104_v33, %v104_v33 }
  0x2f   :  { %752 = vmatpush.bf16.msra.mxu3 %v1605_v6  ;;  %v1518_v43 = vld [vmem:[#allocation5 + $0xf8] sm:$0xf0]  ;;  %v1700_v44 = vld [vmem:[#allocation5 + $0x260] sm:$0xf]  ;;  %v2057_v48 = vld [vmem:[#allocation5 + $0x264] sm:$0xf0]  ;;  %v1773_v52 = vor.u32 %v2075_v39, %v1772_v38 }
  0x30   :  { %726 = vmatpush.bf16.msra.mxu1 %v1477_v10  ;;  %v105_v45 = vld [vmem:[#allocation2 + $0x18] sm:$0xff]  ;;  %v1446_v50 = vld [vmem:[#allocation5 + $0x68] sm:$0xf0]  ;;  %v103_v54 = vld [vmem:[#allocation2 + $0x8] sm:$0xff]  ;;  %v1521_v55 = vor.u32 %v2010_v40, %v1518_v43  ;;  %v1701_v59 = vor.u32 %v2057_v48, %v1700_v44  ;;  %s2297_s28 = smov [#allocation11]  }
  0x31   :  { %714 = vmatpush.bf16.msra.mxu0 %v1405_v16  ;;  %v1992_v49 = vld [vmem:[#allocation5 + $0x64] sm:$0xf]  ;;  %v102_v53 = vld [vmem:[#allocation2] sm:$0xff]  ;;  %v1764_v56 = vld [vmem:[#allocation5 + $0x2e0] sm:$0xf]  ;;  %v2355_v58 = vpack.c.bf16 %v105_v45, %v105_v45  ;;  %v2359_v4 = vpack.c.bf16 %v103_v54, %v103_v54  ;;  %s1380_s29 = sshll.u32 %s2297_s28, 4  ;;  %s1381_s29 = int_to_ptr.vmem [resolvable:$true] %s1380_s29 }
  0x32   :  { %740 = vmatpush.bf16.msra.mxu2 %v1533_v20  ;;  %v2073_v57 = vld [vmem:[#allocation5 + $0x2e4] sm:$0xf0]  ;;  %v1449_v60 = vor.u32 %v1992_v49, %v1446_v50  ;;  %v2008_v61 = vld [vmem:[#allocation5 + $0xe4] sm:$0xf]  ;;  %v1510_v62 = vld [vmem:[#allocation5 + $0xe8] sm:$0xf0]  ;;  %v2357_v3 = vpack.c.bf16 %v102_v53, %v102_v53 }
  0x33   :  { %753 = vmatpush.bf16.msra.mxu3 %v1597_v21  ;;  %v1692_v63 = vld [vmem:[#allocation5 + $0x250] sm:$0xf]  ;;  %v2055_v0 = vld [vmem:[#allocation5 + $0x254] sm:$0xf0]  ;;  %v1990_v1 = vld [vmem:[#allocation5 + $0x54] sm:$0xf]  ;;  %v1765_v5 = vor.u32 %v2073_v57, %v1764_v56  ;;  %v1513_v6 = vor.u32 %v2008_v61, %v1510_v62 }
  0x34   :  { %727 = vmatpush.bf16.msra.mxu1 %v1469_v25  ;;  %v1438_v2 = vld [vmem:[#allocation5 + $0x58] sm:$0xf0]  ;;  %v1756_v7 = vld [vmem:[#allocation5 + $0x2d0] sm:$0xf]  ;;  %v2071_v8 = vld [vmem:[#allocation5 + $0x2d4] sm:$0xf0]  ;;  %v1693_v9 = vor.u32 %v2055_v0, %v1692_v63 }
  0x35   :  { %715 = vmatpush.bf16.msra.mxu0 %v1397_v32  ;;  %v1441_v10 = vor.u32 %v1990_v1, %v1438_v2  ;;  %v2006_v11 = vld [vmem:[#allocation5 + $0xd4] sm:$0xf]  ;;  %v1502_v12 = vld [vmem:[#allocation5 + $0xd8] sm:$0xf0]  ;;  %v1684_v13 = vld [vmem:[#allocation5 + $0x240] sm:$0xf]  ;;  %v1757_v17 = vor.u32 %v2071_v8, %v1756_v7 }
  0x36   :  { %741 = vmatpush.bf16.msra.mxu2 %v1525_v36  ;;  %v2053_v14 = vld [vmem:[#allocation5 + $0x244] sm:$0xf0]  ;;  %v1988_v15 = vld [vmem:[#allocation5 + $0x44] sm:$0xf]  ;;  %v1430_v16 = vld [vmem:[#allocation5 + $0x48] sm:$0xf0]  ;;  %v1505_v18 = vor.u32 %v2006_v11, %v1502_v12 }
  0x37   :  { %754 = vmatpush.bf16.msra.mxu3 %v1589_v37  ;;  %v1748_v19 = vld [vmem:[#allocation5 + $0x2c0] sm:$0xf]  ;;  %v2069_v20 = vld [vmem:[#allocation5 + $0x2c4] sm:$0xf0]  ;;  %v1685_v21 = vor.u32 %v2053_v14, %v1684_v13  ;;  %v1433_v22 = vor.u32 %v1988_v15, %v1430_v16  ;;  %v2004_v23 = vld [vmem:[#allocation5 + $0xc4] sm:$0xf] }
  0x38   :  { %728 = vmatpush.bf16.msra.mxu1 %v1461_v46  ;;  %716 = vmatmul.bf16.vlgmr.msra.gmra.mxu0 %v2357_v3  ;;  %v1494_v24 = vld [vmem:[#allocation5 + $0xc8] sm:$0xf0]  ;;  %v1676_v25 = vld [vmem:[#allocation5 + $0x230] sm:$0xf]  ;;  %v2051_v26 = vld [vmem:[#allocation5 + $0x234] sm:$0xf0]  ;;  %v1749_v29 = vor.u32 %v2069_v20, %v1748_v19 }
  0x39   :  { %760 = vmatpush.bf16.msrb.mxu0 %v1709_v41  ;;  %742 = vmatmul.bf16.vlgmr.msra.gmra.mxu2 %v2353_v51  ;;  %v1986_v27 = vld [vmem:[#allocation5 + $0x34] sm:$0xf]  ;;  %v1422_v28 = vld [vmem:[#allocation5 + $0x38] sm:$0xf0]  ;;  %v1497_v30 = vor.u32 %v2004_v23, %v1494_v24  ;;  %v1740_v31 = vld [vmem:[#allocation5 + $0x2b0] sm:$0xf]  ;;  %v1677_v34 = vor.u32 %v2051_v26, %v1676_v25 }
  0x3a   :  { %793 = vmatpush.bf16.msrb.mxu2 %v1781_v47  ;;  %755 = vmatmul.bf16.vlgmr.msra.gmra.mxu3 %v2355_v58  ;;  %v2067_v32 = vld [vmem:[#allocation5 + $0x2b4] sm:$0xf0]  ;;  %v1425_v35 = vor.u32 %v1986_v27, %v1422_v28  ;;  %v2002_v36 = vld [vmem:[#allocation5 + $0xb4] sm:$0xf]  ;;  %v1486_v37 = vld [vmem:[#allocation5 + $0xb8] sm:$0xf0] }
  0x3b   :  { %799 = vmatpush.bf16.msrb.mxu3 %v1457_v42  ;;  %729 = vmatmul.bf16.vlgmr.msra.gmra.mxu1 %v2359_v4  ;;  %v108_v33 = vld [vmem:[#allocation2 + $0x30] sm:$0xff]  ;;  %v1668_v38 = vld [vmem:[#allocation5 + $0x220] sm:$0xf]  ;;  %v2049_v39 = vld [vmem:[#allocation5 + $0x224] sm:$0xf0]  ;;  %v1741_v42 = vor.u32 %v2067_v32, %v1740_v31  ;;  %v1489_v44 = vor.u32 %v2002_v36, %v1486_v37 }
  0x3c   :  { %773 = vmatpush.bf16.msrb.mxu1 %v1773_v52  ;;  %v1984_v40 = vld [vmem:[#allocation5 + $0x24] sm:$0xf]  ;;  %v1414_v41 = vld [vmem:[#allocation5 + $0x28] sm:$0xf0]  ;;  %v2365_v43 = vpack.c.bf16 %v108_v33, %v108_v33  ;;  %v1732_v45 = vld [vmem:[#allocation5 + $0x2a0] sm:$0xf]  ;;  %v1669_v47 = vor.u32 %v2049_v39, %v1668_v38 }
  0x3d   :  { %761 = vmatpush.bf16.msrb.mxu0 %v1701_v59  ;;  %v2065_v46 = vld [vmem:[#allocation5 + $0x2a4] sm:$0xf0]  ;;  %v1417_v48 = vor.u32 %v1984_v40, %v1414_v41  ;;  %v2000_v49 = vld [vmem:[#allocation5 + $0xa4] sm:$0xf]  ;;  %v1478_v50 = vld [vmem:[#allocation5 + $0xa8] sm:$0xf0] }
  0x3e   :  { %812 = vmatpush.bf16.msra.mxu2 %v1521_v55  ;;  %v1660_v52 = vld [vmem:[#allocation5 + $0x210] sm:$0xf]  ;;  %v2047_v53 = vld [vmem:[#allocation5 + $0x214] sm:$0xf0]  ;;  %v1982_v54 = vld [vmem:[#allocation5 + $0x14] sm:$0xf]  ;;  %v1733_v56 = vor.u32 %v2065_v46, %v1732_v45  ;;  %v1481_v57 = vor.u32 %v2000_v49, %v1478_v50 }
  0x3f   :  { %800 = vmatpush.bf16.msrb.mxu3 %v1449_v60  ;;  %v1406_v55 = vld [vmem:[#allocation5 + $0x18] sm:$0xf0]  ;;  %v1724_v59 = vld [vmem:[#allocation5 + $0x290] sm:$0xf]  ;;  %v2063_v60 = vld [vmem:[#allocation5 + $0x294] sm:$0xf0]  ;;  %v1661_v62 = vor.u32 %v2047_v53, %v1660_v52 }
  0x40   :  { %774 = vmatpush.bf16.msrb.mxu1 %v1765_v5  ;;  %v1998_v61 = vld [vmem:[#allocation5 + $0x94] sm:$0xf]  ;;  %v1409_v63 = vor.u32 %v1982_v54, %v1406_v55  ;;  %v1470_v0 = vld [vmem:[#allocation5 + $0x98] sm:$0xf0]  ;;  %v1652_v1 = vld [vmem:[#allocation5 + $0x200] sm:$0xf]  ;;  %v1725_v8 = vor.u32 %v2063_v60, %v1724_v59 }
  0x41   :  { %762 = vmatpush.bf16.msrb.mxu0 %v1693_v9  ;;  %v2045_v2 = vld [vmem:[#allocation5 + $0x204] sm:$0xf0]  ;;  %v1980_v5 = vld [vmem:[#allocation5 + $0x4] sm:$0xf]  ;;  %v2026_v7 = vld [vmem:[#allocation5 + $0x174] sm:$0xf]  ;;  %v1473_v12 = vor.u32 %v1998_v61, %v1470_v0 }
  0x42   :  { %813 = vmatpush.bf16.msra.mxu2 %v1513_v6  ;;  %v1398_v6 = vld [vmem:[#allocation5 + $0x8] sm:$0xf0]  ;;  %v1582_v9 = vld [vmem:[#allocation5 + $0x178] sm:$0xf0]  ;;  %v1716_v13 = vld [vmem:[#allocation5 + $0x280] sm:$0xf]  ;;  %v1653_v16 = vor.u32 %v2045_v2, %v1652_v1 }
  0x43   :  { %801 = vmatpush.bf16.msrb.mxu3 %v1441_v10  ;;  %v2058_v10 = vld [vmem:[#allocation5 + $0x274] sm:$0xf]  ;;  %v1710_v11 = vld [vmem:[#allocation5 + $0x278] sm:$0xf0]  ;;  %v2061_v14 = vld [vmem:[#allocation5 + $0x284] sm:$0xf0] }
  0x44   :  { %775 = vmatpush.bf16.msrb.mxu1 %v1757_v17  ;;  %v106_v15 = vld [vmem:[#allocation2 + $0x20] sm:$0xff]  ;;  %v1401_v17 = vor.u32 %v1980_v5, %v1398_v6  ;;  %v2042_v20 = vld [vmem:[#allocation5 + $0x1f4] sm:$0xf]  ;;  %v1646_v23 = vld [vmem:[#allocation5 + $0x1f8] sm:$0xf0]  ;;  %v1717_v26 = vor.u32 %v2061_v14, %v1716_v13 }
  0x45   :  { %763 = vmatpush.bf16.msrb.mxu0 %v1685_v21  ;;  %v1462_v19 = vld [vmem:[#allocation5 + $0x88] sm:$0xf0]  ;;  %v1585_v21 = vor.u32 %v2026_v7, %v1582_v9  ;;  %v2074_v24 = vld [vmem:[#allocation5 + $0x2f4] sm:$0xf]  ;;  %v1774_v25 = vld [vmem:[#allocation5 + $0x2f8] sm:$0xf0] }
  0x46   :  { %814 = vmatpush.bf16.msra.mxu2 %v1505_v18  ;;  %v1996_v18 = vld [vmem:[#allocation5 + $0x84] sm:$0xf]  ;;  %v107_v27 = vld [vmem:[#allocation2 + $0x28] sm:$0xff]  ;;  %v1702_v33 = vld [vmem:[#allocation5 + $0x268] sm:$0xf0] }
  0x47   :  { %802 = vmatpush.bf16.msrb.mxu3 %v1433_v22  ;;  %v1713_v22 = vor.u32 %v2058_v10, %v1710_v11  ;;  %v2024_v28 = vld [vmem:[#allocation5 + $0x164] sm:$0xf]  ;;  %v1465_v31 = vor.u32 %v1996_v18, %v1462_v19  ;;  %v2371_v37 = vpack.c.bf16 %v107_v27, %v107_v27  ;;  %v1638_v39 = vld [vmem:[#allocation5 + $0x1e8] sm:$0xf0]  ;;  %v1566_v45 = vld [vmem:[#allocation5 + $0x158] sm:$0xf0] }
  0x48   :  { %776 = vmatpush.bf16.msrb.mxu1 %v1749_v29  ;;  %v1574_v29 = vld [vmem:[#allocation5 + $0x168] sm:$0xf0]  ;;  %v2056_v32 = vld [vmem:[#allocation5 + $0x264] sm:$0xf]  ;;  %v2054_v46 = vld [vmem:[#allocation5 + $0x254] sm:$0xf] }
  0x49   :  { %764 = vmatpush.bf16.msrb.mxu0 %v1677_v34  ;;  %1786 = vmatmul.msk.bf16.vlgmr.msrb.gmra.mxu2 %vm704_vm0, %v2365_v43  ;;  %v1649_v34 = vor.u32 %v2042_v20, %v1646_v23  ;;  %v2040_v36 = vld [vmem:[#allocation5 + $0x1e4] sm:$0xf]  ;;  %v1577_v38 = vor.u32 %v2024_v28, %v1574_v29  ;;  %v1766_v41 = vld [vmem:[#allocation5 + $0x2e8] sm:$0xf0]  ;;  %v2038_v50 = vld [vmem:[#allocation5 + $0x1d4] sm:$0xf] }
  0x4a   :  { %815 = vmatpush.bf16.msra.mxu2 %v1497_v30  ;;  %v2369_v30 = vpack.c.bf16 %v106_v15, %v106_v15  ;;  %v2072_v40 = vld [vmem:[#allocation5 + $0x2e4] sm:$0xf]  ;;  %v1630_v53 = vld [vmem:[#allocation5 + $0x1d8] sm:$0xf0]  ;;  %v2070_v54 = vld [vmem:[#allocation5 + $0x2d4] sm:$0xf] }
  0x4b   :  { %803 = vmatpush.bf16.msrb.mxu3 %v1425_v35  ;;  %v1777_v35 = vor.u32 %v2074_v24, %v1774_v25  ;;  %v1769_v49 = vor.u32 %v2072_v40, %v1766_v41  ;;  %v1758_v55 = vld [vmem:[#allocation5 + $0x2d8] sm:$0xf0]  ;;  %v1558_v59 = vld [vmem:[#allocation5 + $0x148] sm:$0xf0]  ;;  %v2052_v60 = vld [vmem:[#allocation5 + $0x244] sm:$0xf] }
  0x4c   :  { %777 = vmatpush.bf16.msrb.mxu1 %v1741_v42  ;;  %v1705_v42 = vor.u32 %v2056_v32, %v1702_v33  ;;  %v1686_v61 = vld [vmem:[#allocation5 + $0x248] sm:$0xf0]  ;;  %v2036_v0 = vld [vmem:[#allocation5 + $0x1c4] sm:$0xf]  ;;  %v1550_v9 = vld [vmem:[#allocation5 + $0x138] sm:$0xf0] }
  0x4d   :  { %765 = vmatpush.bf16.msrb.mxu0 %v1669_v47  ;;  %v1694_v47 = vld [vmem:[#allocation5 + $0x258] sm:$0xf0]  ;;  %v1622_v2 = vld [vmem:[#allocation5 + $0x1c8] sm:$0xf0]  ;;  %v2068_v5 = vld [vmem:[#allocation5 + $0x2c4] sm:$0xf]  ;;  %v1689_v7 = vor.u32 %v2052_v60, %v1686_v61 }
  0x4e   :  { %816 = vmatpush.bf16.msra.mxu2 %v1489_v44  ;;  %v2022_v44 = vld [vmem:[#allocation5 + $0x154] sm:$0xf]  ;;  %v1750_v6 = vld [vmem:[#allocation5 + $0x2c8] sm:$0xf0]  ;;  %v1625_v11 = vor.u32 %v2036_v0, %v1622_v2  ;;  %v1614_v14 = vld [vmem:[#allocation5 + $0x1b8] sm:$0xf0] }
  0x4f   :  { %804 = vmatpush.bf16.msrb.mxu3 %v1417_v48  ;;  %v1641_v48 = vor.u32 %v2040_v36, %v1638_v39  ;;  %v1569_v52 = vor.u32 %v2022_v44, %v1566_v45  ;;  %v2050_v10 = vld [vmem:[#allocation5 + $0x234] sm:$0xf]  ;;  %v2016_v18 = vld [vmem:[#allocation5 + $0x124] sm:$0xf]  ;;  %v1542_v19 = vld [vmem:[#allocation5 + $0x128] sm:$0xf0] }
  0x50   :  { %778 = vmatpush.bf16.msrb.mxu1 %v1733_v56  ;;  %v1697_v56 = vor.u32 %v2054_v46, %v1694_v47  ;;  %v2066_v15 = vld [vmem:[#allocation5 + $0x2b4] sm:$0xf]  ;;  %v2048_v20 = vld [vmem:[#allocation5 + $0x224] sm:$0xf]  ;;  %v1545_v25 = vor.u32 %v2016_v18, %v1542_v19  ;;  %v1734_v28 = vld [vmem:[#allocation5 + $0x2a8] sm:$0xf0] }
  0x51   :  { %766 = vmatpush.bf16.msrb.mxu0 %v1661_v62  ;;  %v1633_v62 = vor.u32 %v2038_v50, %v1630_v53  ;;  %v2032_v24 = vld [vmem:[#allocation5 + $0x1a4] sm:$0xf]  ;;  %v1534_v32 = vld [vmem:[#allocation5 + $0x118] sm:$0xf0]  ;;  %v2046_v33 = vld [vmem:[#allocation5 + $0x214] sm:$0xf] }
  0x52   :  { %817 = vmatpush.bf16.msra.mxu2 %v1481_v57  ;;  %v2020_v57 = vld [vmem:[#allocation5 + $0x144] sm:$0xf]  ;;  %v1598_v40 = vld [vmem:[#allocation5 + $0x198] sm:$0xf0]  ;;  %v2062_v41 = vld [vmem:[#allocation5 + $0x294] sm:$0xf] }
  0x53   :  { %805 = vmatpush.bf16.msrb.mxu3 %v1409_v63  ;;  %v1761_v63 = vor.u32 %v2070_v54, %v1758_v55  ;;  %v1561_v1 = vor.u32 %v2020_v57, %v1558_v59  ;;  %v2064_v27 = vld [vmem:[#allocation5 + $0x2a4] sm:$0xf]  ;;  %v1526_v46 = vld [vmem:[#allocation5 + $0x108] sm:$0xf0]  ;;  %v1838_v19 = vld [vmem:[#allocation8 + $0x60] sm:$0xf] }
  0x54   :  { %779 = vmatpush.bf16.msrb.mxu1 %v1725_v8  ;;  %v2018_v8 = vld [vmem:[#allocation5 + $0x134] sm:$0xf]  ;;  %v1737_v36 = vor.u32 %v2064_v27, %v1734_v28  ;;  %v2012_v45 = vld [vmem:[#allocation5 + $0x104] sm:$0xf]  ;;  %v1782_v50 = vld [vmem:[#allocation5 + $0x308] sm:$0xf0] }
  0x55   :  { %767 = vmatpush.bf16.msrb.mxu0 %v1653_v16  ;;  %v1553_v13 = vor.u32 %v2018_v8, %v1550_v9  ;;  %v1742_v16 = vld [vmem:[#allocation5 + $0x2b8] sm:$0xf0]  ;;  %v2044_v47 = vld [vmem:[#allocation5 + $0x204] sm:$0xf]  ;;  %v1529_v54 = vor.u32 %v2012_v45, %v1526_v46  ;;  %v1718_v60 = vld [vmem:[#allocation5 + $0x288] sm:$0xf0] }
  0x56   :  { %818 = vmatpush.bf16.msra.mxu2 %v1473_v12  ;;  %v2034_v12 = vld [vmem:[#allocation5 + $0x1b4] sm:$0xf]  ;;  %v1745_v23 = vor.u32 %v2066_v15, %v1742_v16  ;;  %v2028_v55 = vld [vmem:[#allocation5 + $0x184] sm:$0xf]  ;;  %v1832_v45 = vld [vmem:[#allocation8 + $0x58] sm:$0xf0] }
  0x57   :  { %806 = vmatpush.bf16.msrb.mxu3 %v1401_v17  ;;  %v2060_v59 = vld [vmem:[#allocation5 + $0x284] sm:$0xf] }
  0x58   :  { %780 = vmatpush.bf16.msrb.mxu1 %v1717_v26  ;;  %768 = vmatmul.bf16.vlgmr.msrb.gmra.mxu0 %v2369_v30  ;;  %v1606_v26 = vld [vmem:[#allocation5 + $0x1a8] sm:$0xf0]  ;;  %v2108_v16 = vld [vmem:[#allocation8 + $0xf4] sm:$0xf] }
  0x59   :  { %825 = vmatpush.bf16.msra.mxu0 %v1585_v21  ;;  %v1670_v21 = vld [vmem:[#allocation5 + $0x228] sm:$0xf0] }
  0x5a   :  { %819 = vmatpush.bf16.msra.mxu2 %v1465_v31  ;;  %807 = vmatmul.bf16.vlgmr.msrb.gmra.mxu3 %v2357_v3  ;;  %v1753_v3 = vor.u32 %v2068_v5, %v1750_v6  ;;  %v1673_v29 = vor.u32 %v2048_v20, %v1670_v21  ;;  %v2014_v31 = vld [vmem:[#allocation5 + $0x114] sm:$0xf]  ;;  %v2091_v20 = vld [vmem:[#allocation8 + $0x64] sm:$0xf0] }
  0x5b   :  { %851 = vmatpush.bf16.msra.mxu3 %v1713_v22  ;;  %781 = vmatmul.bf16.vlgmr.msrb.gmra.mxu1 %v2371_v37  ;;  %v1617_v22 = vor.u32 %v2034_v12, %v1614_v14  ;;  %v1537_v39 = vor.u32 %v2014_v31, %v1534_v32  ;;  %v2092_v12 = vld [vmem:[#allocation8 + $0x74] sm:$0xf]  ;;  %v1902_v21 = vld [vmem:[#allocation8 + $0xe0] sm:$0xf]  ;;  %v1904_v31 = vld [vmem:[#allocation8 + $0xe8] sm:$0xf0] }
  0x5c   :  { %838 = vmatpush.bf16.msra.mxu1 %v1649_v34  ;;  %v1662_v34 = vld [vmem:[#allocation5 + $0x218] sm:$0xf0]  ;;  %v891_v32 = vld [vmem:[#allocation7] sm:$0x3] }
  0x5d   :  { %826 = vmatpush.bf16.msra.mxu0 %v1577_v38  ;;  %820 = vmatmul.bf16.vlgmr.msra.gmra.mxu2 %v2359_v4  ;;  %v1678_v4 = vld [vmem:[#allocation5 + $0x238] sm:$0xf0]  ;;  %v2030_v38 = vld [vmem:[#allocation5 + $0x194] sm:$0xf]  ;;  %v1665_v44 = vor.u32 %v2046_v33, %v1662_v34  ;;  %893 = vst [vmem:[#allocation1] ss:$9 sm:$0xff] %v891_v32 }
  0x5e   :  { %864 = vmatpush.bf16.msrb.mxu2 %v1777_v35  ;;  %v1681_v17 = vor.u32 %v2050_v10, %v1678_v4  ;;  %v1609_v35 = vor.u32 %v2032_v24, %v1606_v26  ;;  %v2093_v10 = vld [vmem:[#allocation8 + $0x74] sm:$0xf0]  ;;  %v1910_v4 = vld [vmem:[#allocation8 + $0xf0] sm:$0xf]  ;;  %v2090_v24 = vld [vmem:[#allocation8 + $0x64] sm:$0xf] }
  0x5f   :  { %852 = vmatpush.bf16.msra.mxu3 %v1705_v42  ;;  %v1726_v42 = vld [vmem:[#allocation5 + $0x298] sm:$0xf0]  ;;  %v1170_v32 = vld [vmem:[%s2431_s4] sm:$0x3] }
  0x60   :  { %839 = vmatpush.bf16.msra.mxu1 %v1641_v48  ;;  %v1654_v48 = vld [vmem:[#allocation5 + $0x208] sm:$0xf0]  ;;  %v1729_v53 = vor.u32 %v2062_v41, %v1726_v42 }
  0x61   :  { %827 = vmatpush.bf16.msra.mxu0 %v1569_v52  ;;  %v1601_v52 = vor.u32 %v2030_v38, %v1598_v40  ;;  %v1657_v57 = vor.u32 %v2044_v47, %v1654_v48  ;;  %v1830_v38 = vld [vmem:[#allocation8 + $0x50] sm:$0xf]  ;;  %v2105_v42 = vld [vmem:[#allocation8 + $0xd4] sm:$0xf0]  ;;  %v2104_v48 = vld [vmem:[#allocation8 + $0xd4] sm:$0xf] }
  0x62   :  { %865 = vmatpush.bf16.msrb.mxu2 %v1769_v49  ;;  %v2076_v49 = vld [vmem:[#allocation5 + $0x304] sm:$0xf] }
  0x63   :  { %853 = vmatpush.bf16.msra.mxu3 %v1697_v56  ;;  %v1590_v56 = vld [vmem:[#allocation5 + $0x188] sm:$0xf0]  ;;  %v1785_v61 = vor.u32 %v2076_v49, %v1782_v50  ;;  %v1894_v40 = vld [vmem:[#allocation8 + $0xd0] sm:$0xf] }
  0x64   :  { %840 = vmatpush.bf16.msra.mxu1 %v1633_v62  ;;  %v1593_v62 = vor.u32 %v2028_v55, %v1590_v56  ;;  %v1895_v46 = vor.u32 %v2105_v42, %v1894_v40  ;;  %v1896_v49 = vld [vmem:[#allocation8 + $0xd8] sm:$0xf0]  ;;  %v2103_v56 = vld [vmem:[#allocation8 + $0xc4] sm:$0xf0]  ;;  %v2097_v40 = vld [vmem:[#allocation8 + $0x94] sm:$0xf0] }
  0x65   :  { %828 = vmatpush.bf16.msra.mxu0 %v1561_v1  ;;  %v1899_v50 = vor.u32 %v2104_v48, %v1896_v49  ;;  %v1864_v49 = vld [vmem:[#allocation8 + $0x98] sm:$0xf0] }
  0x66   :  { %866 = vmatpush.bf16.msrb.mxu2 %v1761_v63  ;;  %v1721_v63 = vor.u32 %v2060_v59, %v1718_v60  ;;  %v1824_v59 = vld [vmem:[#allocation8 + $0x48] sm:$0xf0] }
  0x67   :  { %854 = vmatpush.bf16.msra.mxu3 %v1689_v7 }
  0x68   :  { %841 = vmatpush.bf16.msra.mxu1 %v1625_v11 }
  0x69   :  { %829 = vmatpush.bf16.msra.mxu0 %v1553_v13  ;;  %v1848_v13 = vld [vmem:[#allocation8 + $0x78] sm:$0xf0] }
  0x6a   :  { %867 = vmatpush.bf16.msrb.mxu2 %v1753_v3  ;;  %v2109_v3 = vld [vmem:[#allocation8 + $0xf4] sm:$0xf0]  ;;  %v1851_v15 = vor.u32 %v2092_v12, %v1848_v13  ;;  %v1816_v12 = vld [vmem:[#allocation8 + $0x38] sm:$0xf0]  ;;  %v2100_v13 = vld [vmem:[#allocation8 + $0xb4] sm:$0xf] }
  0x6b   :  { %855 = vmatpush.bf16.msra.mxu3 %v1681_v17  ;;  %v1911_v14 = vor.u32 %v2109_v3, %v1910_v4  ;;  %v1912_v17 = vld [vmem:[#allocation8 + $0xf8] sm:$0xf0]  ;;  %v2101_v4 = vld [vmem:[#allocation8 + $0xb4] sm:$0xf0] }
  0x6c   :  { %842 = vmatpush.bf16.msra.mxu1 %v1617_v22  ;;  %v1915_v18 = vor.u32 %v2108_v16, %v1912_v17  ;;  %v1839_v22 = vor.u32 %v2091_v20, %v1838_v19  ;;  %v1806_v17 = vld [vmem:[#allocation8 + $0x20] sm:$0xf] }
  0x6d   :  { %830 = vmatpush.bf16.msra.mxu0 %v1545_v25  ;;  %v1840_v25 = vld [vmem:[#allocation8 + $0x68] sm:$0xf0]  ;;  %v1870_v19 = vld [vmem:[#allocation8 + $0xa0] sm:$0xf] }
  0x6e   :  { %868 = vmatpush.bf16.msrb.mxu2 %v1745_v23  ;;  %v2107_v23 = vld [vmem:[#allocation8 + $0xe4] sm:$0xf0]  ;;  %v1843_v28 = vor.u32 %v2090_v24, %v1840_v25 }
  0x6f   :  { %856 = vmatpush.bf16.msra.mxu3 %v1673_v29  ;;  %v1903_v27 = vor.u32 %v2107_v23, %v1902_v21  ;;  %v2106_v29 = vld [vmem:[#allocation8 + $0xe4] sm:$0xf]  ;;  %v2099_v21 = vld [vmem:[#allocation8 + $0xa4] sm:$0xf0]  ;;  %v1808_v23 = vld [vmem:[#allocation8 + $0x28] sm:$0xf0] }
  0x70   :  { %843 = vmatpush.bf16.msra.mxu1 %v1609_v35  ;;  %v1907_v34 = vor.u32 %v2106_v29, %v1904_v31  ;;  %v1871_v24 = vor.u32 %v2099_v21, %v1870_v19  ;;  %v2403_v29 = vld [vmem:[#allocation1 + $0x9] sm:$0xff] }
  0x71   :  { %831 = vmatpush.bf16.msra.mxu0 %v1537_v39  ;;  %v2089_v39 = vld [vmem:[#allocation8 + $0x54] sm:$0xf0] }
  0x72   :  { %869 = vmatpush.bf16.msrb.mxu2 %v1737_v36  ;;  %v1831_v41 = vor.u32 %v2089_v39, %v1830_v38  ;;  %v1862_v39 = vld [vmem:[#allocation8 + $0x90] sm:$0xf] }
  0x73   :  { %857 = vmatpush.bf16.msra.mxu3 %v1665_v44  ;;  %v2088_v44 = vld [vmem:[#allocation8 + $0x54] sm:$0xf]  ;;  %v1863_v42 = vor.u32 %v2097_v40, %v1862_v39 }
  0x74   :  { %844 = vmatpush.bf16.msra.mxu1 %v1601_v52  ;;  %v1835_v47 = vor.u32 %v2088_v44, %v1832_v45  ;;  %v1822_v52 = vld [vmem:[#allocation8 + $0x40] sm:$0xf]  ;;  %v2080_v44 = vld [vmem:[#allocation8 + $0x14] sm:$0xf]  ;;  %v1800_v45 = vld [vmem:[#allocation8 + $0x18] sm:$0xf0] }
  0x75   :  { %832 = vmatpush.bf16.msra.mxu0 %v1529_v54  ;;  %v1886_v54 = vld [vmem:[#allocation8 + $0xc0] sm:$0xf]  ;;  %v1803_v48 = vor.u32 %v2080_v44, %v1800_v45  ;;  %v2124_v44 = vld [vmem:[#allocation10 + $0x70] sm:$0xff]  ;;  %v2115_v45 = vld [vmem:[#allocation10 + $0x28] sm:$0xff] }
  0x76   :  { %870 = vmatpush.bf16.msrb.mxu2 %v1729_v53  ;;  %v2087_v53 = vld [vmem:[#allocation8 + $0x44] sm:$0xf0]  ;;  %v1887_v60 = vor.u32 %v2103_v56, %v1886_v54 }
  0x77   :  { %858 = vmatpush.bf16.msra.mxu3 %v1657_v57  ;;  %v1823_v55 = vor.u32 %v2087_v53, %v1822_v52  ;;  %v2086_v57 = vld [vmem:[#allocation8 + $0x44] sm:$0xf]  ;;  %v2079_v52 = vld [vmem:[#allocation8 + $0x4] sm:$0xf0] }
  0x78   :  { %845 = vmatpush.bf16.msra.mxu1 %v1593_v62  ;;  %833 = vmatmul.bf16.vlgmr.msra.gmra.mxu0 %v2353_v51  ;;  %v2102_v62 = vld [vmem:[#allocation8 + $0xc4] sm:$0xf]  ;;  %v2095_v56 = vld [vmem:[#allocation8 + $0x84] sm:$0xf0] }
  0x79   :  { %884 = vmatpush.bf16.msrb.mxu0 %v1785_v61  ;;  %v1827_v61 = vor.u32 %v2086_v57, %v1824_v59  ;;  %v2078_v57 = vld [vmem:[#allocation8 + $0x4] sm:$0xf] }
  0x7a   :  { %859 = vmatmul.bf16.vlgmr.msra.gmra.mxu3 %v2369_v30  ;;  %871 = vmatpush.bf16.msrb.mxu2 %v1721_v63 }
  0x7b   :  { %846 = vmatmul.bf16.vlgmr.msra.gmra.mxu1 %v2355_v58  ;;  %1130 = vmatpush.bf16.msrb.mxu3 %v1911_v14  ;;  %v1880_v14 = vld [vmem:[#allocation8 + $0xb8] sm:$0xf0] }
  0x7c   :  { %v1883_v16 = vor.u32 %v2100_v13, %v1880_v14  ;;  %v899_v13 = vpack.i.b16 %v2403_v29, %v2403_v29 }
  0x7d   :  { %872 = vmatmul.bf16.vlgmr.msrb.gmra.mxu2 %v2371_v37  ;;  %1143 = vmatpush.bf16.msra.mxu0 %v1851_v15 }
  0x7e   :  { %1156 = vmatpush.bf16.msra.mxu2 %v1915_v18  ;;  %v2083_v18 = vld [vmem:[#allocation8 + $0x24] sm:$0xf0] }
  0x7f   :  { %1131 = vmatpush.bf16.msrb.mxu3 %v1903_v27  ;;  %v1807_v20 = vor.u32 %v2083_v18, %v1806_v17  ;;  %v1872_v27 = vld [vmem:[#allocation8 + $0xa8] sm:$0xf0]  ;;  %v901_v17 = vperm.slane %v899_v13, 0 }
  0x81   :  { %1144 = vmatpush.bf16.msra.mxu0 %v1843_v28  ;;  %v2401_v28 = vld [vmem:[#allocation1] sm:$0xff] }
  0x82   :  { %1157 = vmatpush.bf16.msra.mxu2 %v1907_v34  ;;  %v1798_v34 = vld [vmem:[#allocation8 + $0x10] sm:$0xf]  ;;  %1172 = vst [vmem:[#allocation1] ss:$9 sm:$0xff] %v1170_v32 }
  0x83   :  { %1132 = vmatpush.bf16.msrb.mxu3 %v1895_v46  ;;  %v2096_v46 = vld [vmem:[#allocation8 + $0x94] sm:$0xf] }
  0x84   :  { %v1867_v53 = vor.u32 %v2096_v46, %v1864_v49  ;;  %v2123_v46 = vld [vmem:[#allocation10 + $0x68] sm:$0xff]  ;;  %v2113_v49 = vld [vmem:[#allocation10 + $0x18] sm:$0xff] }
  0x85   :  { %1145 = vmatpush.bf16.msra.mxu0 %v1835_v47 }
  0x86   :  { %1158 = vmatpush.bf16.msra.mxu2 %v1899_v50  ;;  %v1790_v50 = vld [vmem:[#allocation8] sm:$0xf] }
  0x87   :  { %1133 = vmatpush.bf16.msrb.mxu3 %v1887_v60  ;;  %v1791_v54 = vor.u32 %v2079_v52, %v1790_v50  ;;  %v1856_v60 = vld [vmem:[#allocation8 + $0x88] sm:$0xf0]  ;;  %v2121_v50 = vld [vmem:[#allocation10 + $0x58] sm:$0xff]  ;;  %v2112_v52 = vld [vmem:[#allocation10 + $0x10] sm:$0xff] }
  0x88   :  { %1787 = vmatmul.msk.bf16.vlgmr.msrb.gmra.mxu0 %vm704_vm0, %v2365_v43  ;;  %v1846_v43 = vld [vmem:[#allocation8 + $0x70] sm:$0xf] }
  0x89   :  { %v1847_v11 = vor.u32 %v2093_v10, %v1846_v43  ;;  %1146 = vmatpush.bf16.msra.mxu0 %v1827_v61  ;;  %v1878_v43 = vld [vmem:[#allocation8 + $0xb0] sm:$0xf] }
  0x8a   :  { %v1879_v3 = vor.u32 %v2101_v4, %v1878_v43  ;;  %v2117_v43 = vld [vmem:[#allocation10 + $0x38] sm:$0xff] }
  0x8b   :  { %1117 = vmatpush.bf16.msrb.mxu1 %v1847_v11  ;;  %v2084_v11 = vld [vmem:[#allocation8 + $0x34] sm:$0xf] }
  0x8c   :  { %v1819_v15 = vor.u32 %v2084_v11, %v1816_v12  ;;  %1134 = vmatpush.bf16.msrb.mxu3 %v1879_v3  ;;  %v896_v12 = vpack.i.b16 %v2401_v28, %v2401_v28 }
  0x8e   :  { %1147 = vmatpush.bf16.msra.mxu0 %v1819_v15 }
  0x8f   :  { %1118 = vmatpush.bf16.msrb.mxu1 %v1839_v22  ;;  %v2082_v22 = vld [vmem:[#allocation8 + $0x24] sm:$0xf] }
  0x90   :  { %v1811_v25 = vor.u32 %v2082_v22, %v1808_v23  ;;  %1135 = vmatpush.bf16.msrb.mxu3 %v1871_v24  ;;  %v905_v23 = vunpack.c.l.bf16 %v901_v17 }
  0x92   :  { %1148 = vmatpush.bf16.msra.mxu0 %v1811_v25 }
  0x93   :  { %1119 = vmatpush.bf16.msrb.mxu1 %v1831_v41 }
  0x94   :  { %1136 = vmatpush.bf16.msrb.mxu3 %v1863_v42  ;;  %v2116_v42 = vld [vmem:[#allocation10 + $0x30] sm:$0xff] }
  0x96   :  { %1149 = vmatpush.bf16.msra.mxu0 %v1803_v48  ;;  %v2122_v48 = vld [vmem:[#allocation10 + $0x60] sm:$0xff] }
  0x97   :  { %1120 = vmatpush.bf16.msrb.mxu1 %v1823_v55  ;;  %v1854_v55 = vld [vmem:[#allocation8 + $0x80] sm:$0xf] }
  0x98   :  { %v1855_v59 = vor.u32 %v2095_v56, %v1854_v55  ;;  %v2119_v55 = vld [vmem:[#allocation10 + $0x48] sm:$0xff]  ;;  %v2110_v56 = vld [vmem:[#allocation10] sm:$0xff] }
  0x9a   :  { %1137 = vmatpush.bf16.msrb.mxu3 %v1855_v59  ;;  %v1173_v59 = vld [vmem:[#allocation1] sm:$0xff] }
  0xb5   :  { %v2383_v0 = vpop.f32.mrf.mxu0 }
  0xb8   :  { %v2385_v1 = vpop.f32.mrf.mxu1 }
  0xb9   :  { %v731_v41 = vadd.f32 %v2385_v1, %v2383_v0  ;;  %v1792_v0 = vld [vmem:[#allocation8 + $0x8] sm:$0xf0]  ;;  %v2094_v1 = vld [vmem:[#allocation8 + $0x84] sm:$0xf] }
  0xbc   :  { %v2387_v2 = vpop.f32.mrf.mxu2 }
  0xbd   :  { %v2389_v5 = vpop.f32.mrf.mxu3  ;;  %v719_v6 = vpop.f32.mrf.mxu0  ;;  %v744_v61 = vadd.f32 %v2387_v2, %v731_v41 }
  0xbe   :  { %v1888_v6 = vld [vmem:[#allocation8 + $0xc8] sm:$0xf0] }
  0xc0   :  { %v732_v51 = vpop.f32.mrf.mxu1 }
  0xc4   :  { %v745_v7 = vpop.f32.mrf.mxu2 }
  0xc5   :  { %v758_v30 = vpop.f32.mrf.mxu3  ;;  %v1891_v7 = vor.u32 %v2102_v62, %v1888_v6  ;;  %v1795_v6 = vor.u32 %v2078_v57, %v1792_v0  ;;  %v2118_v57 = vld [vmem:[#allocation10 + $0x40] sm:$0xff]  ;;  %v1174_v0 = vld [vmem:[#allocation1 + $0x9] sm:$0xff] }
  0xc6   :  { %v1814_v30 = vld [vmem:[#allocation8 + $0x30] sm:$0xf] }
  0xc7   :  { %1159 = vmatpush.bf16.msra.mxu2 %v1891_v7  ;;  %1150 = vmatpush.bf16.msra.mxu0 %v1795_v6 }
  0xcb   :  { %1160 = vmatpush.bf16.msra.mxu2 %v1883_v16  ;;  %v898_v16 = vperm.slane %v896_v12, 0 }
  0xcc   :  { %v2391_v8 = vpop.f32.mrf.mxu2 }
  0xcd   :  { %v904_v22 = vunpack.c.l.bf16 %v898_v16 }
  0xd4   :  { %v797_v37 = vpop.f32.mrf.mxu2 }
  0xd5   :  { %v2393_v58 = vpop.f32.mrf.mxu0  ;;  %v2085_v37 = vld [vmem:[#allocation8 + $0x34] sm:$0xf0] }
  0xd6   :  { %v1815_v10 = vor.u32 %v2085_v37, %v1814_v30  ;;  %v757_v30 = vadd.f32 %v2389_v5, %v744_v61  ;;  %v1175_v61 = vpack.i.b16 %v1173_v59, %v1173_v59 }
  0xd8   :  { %v2395_v9 = vpop.f32.mrf.mxu1  ;;  %1121 = vmatpush.bf16.msrb.mxu1 %v1815_v10  ;;  %v2125_v10 = vld [vmem:[#allocation10 + $0x78] sm:$0xff]  ;;  %v770_v2 = vadd.f32 %v2393_v58, %v757_v30  ;;  %v1177_v6 = vperm.slane %v1175_v61, 0 }
  0xd9   :  { %1345 = vmatpush.bf16.msra.mxu3 %v2125_v10 }
  0xda   :  { %v783_v5 = vadd.f32 %v2395_v9, %v770_v2  ;;  %v1183_v2 = vunpack.c.l.bf16 %v1177_v6 }
  0xdc   :  { %1122 = vmatpush.bf16.msrb.mxu1 %v1807_v20  ;;  %v796_v58 = vadd.f32 %v2391_v8, %v783_v5 }
  0xdd   :  { %v771_v26 = vpop.f32.mrf.mxu0  ;;  %v2399_v35 = vpop.f32.mrf.mxu3  ;;  %1346 = vmatpush.bf16.msra.mxu3 %v2124_v44 }
  0xde   :  { %v2098_v26 = vld [vmem:[#allocation8 + $0xa4] sm:$0xf] }
  0xdf   :  { %v1875_v31 = vor.u32 %v2098_v26, %v1872_v27 }
  0xe0   :  { %v2397_v33 = vpop.f32.mrf.mxu2  ;;  %v784_v36 = vpop.f32.mrf.mxu1 }
  0xe1   :  { %v2081_v36 = vld [vmem:[#allocation8 + $0x14] sm:$0xf0]  ;;  %1161 = vmatpush.bf16.msra.mxu2 %v1875_v31  ;;  %v822_v62 = vadd.f32 %v2397_v33, %v2399_v35  ;;  %1347 = vmatpush.bf16.msra.mxu3 %v2123_v46 }
  0xe2   :  { %v1799_v38 = vor.u32 %v2081_v36, %v1798_v34 }
  0xe4   :  { %1123 = vmatpush.bf16.msrb.mxu1 %v1799_v38 }
  0xe5   :  { %v810_v51 = vpop.f32.mrf.mxu3  ;;  %1162 = vmatpush.bf16.msra.mxu2 %v1867_v53  ;;  %1348 = vmatpush.bf16.msra.mxu3 %v2122_v48  ;;  %v2120_v53 = vld [vmem:[#allocation10 + $0x50] sm:$0xff] }
  0xe6   :  { %v1859_v51 = vor.u32 %v2094_v1, %v1856_v60 }
  0xe8   :  { %v823_v63 = vpop.f32.mrf.mxu2  ;;  %1124 = vmatpush.bf16.msrb.mxu1 %v1791_v54  ;;  %v2111_v54 = vld [vmem:[#allocation10 + $0x8] sm:$0xff] }
  0xe9   :  { %1163 = vmatpush.bf16.msra.mxu2 %v1859_v51  ;;  %1349 = vmatpush.bf16.msra.mxu3 %v2121_v50 }
  0xec   :  { %1332 = vmatpush.bf16.msra.mxu1 %v2117_v43 }
  0xed   :  { %1350 = vmatpush.bf16.msra.mxu3 %v2120_v53 }
  0xf0   :  { %1333 = vmatpush.bf16.msra.mxu1 %v2116_v42 }
  0xf1   :  { %1351 = vmatpush.bf16.msra.mxu3 %v2119_v55 }
  0xf4   :  { %1334 = vmatpush.bf16.msra.mxu1 %v2115_v45 }
  0xf5   :  { %v834_v47 = vpop.f32.mrf.mxu0  ;;  %1352 = vmatpush.bf16.msra.mxu3 %v2118_v57 }
  0xf6   :  { %v835_v7 = vadd.f32 %v834_v47, %v822_v62  ;;  %v2114_v47 = vld [vmem:[#allocation10 + $0x20] sm:$0xff]  ;;  %v1178_v62 = vpack.i.b16 %v1174_v0, %v1174_v0 }
  0xf8   :  { %v847_v63 = vpop.f32.mrf.mxu1  ;;  %1335 = vmatpush.bf16.msra.mxu1 %v2114_v47  ;;  %v1180_v51 = vperm.slane %v1178_v62, 0 }
  0xf9   :  { %v848_v11 = vadd.f32 %v847_v63, %v835_v7 }
  0xfc   :  { %1336 = vmatpush.bf16.msra.mxu1 %v2113_v49 }
  0xfd   :  { %v860_v37 = vpop.f32.mrf.mxu3  ;;  %v836_v4 = vpop.f32.mrf.mxu0 }
  0xfe   :  { %v861_v35 = vadd.f32 %v860_v37, %v848_v11  ;;  %v1184_v11 = vunpack.c.l.bf16 %v1180_v51 }
 0x100   :  { %v873_v33 = vpop.f32.mrf.mxu2  ;;  %v849_v3 = vpop.f32.mrf.mxu1  ;;  %1337 = vmatpush.bf16.msra.mxu1 %v2112_v52 }
 0x101   :  { %v874_v14 = vadd.f32 %v873_v33, %v861_v35 }
 0x104   :  { %1338 = vmatpush.bf16.msra.mxu1 %v2111_v54 }
 0x105   :  { %v862_v15 = vpop.f32.mrf.mxu3  ;;  %v886_v18 = vpop.f32.mrf.mxu0 }
 0x106   :  { %v887_v19 = vadd.f32 %v886_v18, %v874_v14 }
 0x108   :  { %v875_v20 = vpop.f32.mrf.mxu2  ;;  %v890_v21 = vpack.c.bf16 %v887_v19, %v796_v58  ;;  %1339 = vmatpush.bf16.msra.mxu1 %v2110_v56 }
 0x10a   :  { %v902_v24 = vunpack.c.l.bf16 %v890_v21  ;;  %v903_v25 = vunpack.c.h.bf16 %v890_v21 }
 0x10c   :  { %v906_v26 = vadd.f32 %v904_v22, %v902_v24  ;;  %v907_v27 = vadd.f32 %v905_v23, %v903_v25  ;;  %v1359_v24 = vld [vmem:[%s2433_s6] sm:$0x1]  ;;  %s1382_s6 = sshll.u32 %s2434_s7, 4  ;;  %s1383_s6 = int_to_ptr.hbm [resolvable:$true] %s1382_s6 }
 0x10d   :  { %v888_v28 = vpop.f32.mrf.mxu0 }
 0x10e   :  { %v908_v29 = vpack.c.bf16 %v907_v27, %v906_v26  ;;  %v1361_v26 = vpack.i.b16 %v1359_v24, %v1359_v24 }
 0x110   :  { %v909_v31 = vunpack.c.l.bf16 %v908_v29  ;;  %v910_v9 = vunpack.c.h.bf16 %v908_v29  ;;  %v1363_v27 = vperm.slane %v1361_v26, 0 }
 0x112   :  { %v913_v32 = vmul.f32 0.010009766, %v909_v31  ;;  %v914_v34 = vmul.f32 0.010009766, %v910_v9  ;;  %vm911_vm1 = vcmp.gt.f32.partialorder %v909_v31, 0.0  ;;  %vm912_vm2 = vcmp.gt.f32.partialorder %v910_v9, 0.0 }
 0x113   :  { %vm916_vm3 = vmpackc.low %vm912_vm2, %vm911_vm1 }
 0x114   :  { %v915_v36 = vpack.c.bf16 %v914_v34, %v913_v32  ;;  %v1365_v32 = vunpack.c.l.bf16 %v1363_v27 }
 0x116   :  { %v917_v8 = vsel %vm916_vm3, %v908_v29, %v915_v36 }
 0x117   :  { %v951_v38 = vunpack.c.l.b16 %v917_v8  ;;  %v952_v39 = vunpack.c.h.b16 %v917_v8 }
 0x119   :  { %v953_v40 = vpack.c.b16 %v951_v38, %v951_v38  ;;  %v954_v41 = vpack.c.b16 %v952_v39, %v952_v39 }
 0x11b   :  { %1125 = vmatmul.bf16.vlgmr.msrb.gmra.mxu1 %v953_v40  ;;  %1138 = vmatmul.bf16.vlgmr.msrb.gmra.mxu3 %v954_v41 }
 0x11c   :  { %1151 = vmatmul.bf16.vlgmr.msra.gmra.mxu0 %v953_v40  ;;  %1164 = vmatmul.bf16.vlgmr.msra.gmra.mxu2 %v954_v41 }
 0x198   :  { %v1126_v1 = vpop.f32.mrf.mxu1 }
 0x199   :  { %v1152_v60 = vpop.f32.mrf.mxu0 }
 0x19e   :  { %v1139_v63 = vpop.f32.mrf.mxu3 }
 0x19f   :  { %v1140_v7 = vadd.f32 %v1139_v63, %v1126_v1  ;;  %v1165_v30 = vpop.f32.mrf.mxu2 }
 0x1a0   :  { %v1166_v37 = vadd.f32 %v1165_v30, %v1152_v60  ;;  %v1128_v43 = vpop.f32.mrf.mxu1 }
 0x1a1   :  { %v1154_v10 = vpop.f32.mrf.mxu0 }
 0x1a2   :  { %v1169_v4 = vpack.c.bf16 %v1166_v37, %v1140_v7 }
 0x1a4   :  { %v1181_v33 = vunpack.c.l.bf16 %v1169_v4  ;;  %v1182_v35 = vunpack.c.h.bf16 %v1169_v4 }
 0x1a6   :  { %v1185_v3 = vadd.f32 %v1183_v2, %v1181_v33  ;;  %v1186_v12 = vadd.f32 %v1184_v11, %v1182_v35  ;;  %v1141_v13 = vpop.f32.mrf.mxu3 }
 0x1a7   :  { %v1167_v5 = vpop.f32.mrf.mxu2 }
 0x1a8   :  { %v1187_v14 = vpack.c.bf16 %v1186_v12, %v1185_v3 }
 0x1aa   :  { %v1188_v15 = vunpack.c.l.bf16 %v1187_v14  ;;  %v1189_v16 = vunpack.c.h.bf16 %v1187_v14 }
 0x1ac   :  { %v1192_v17 = vmul.f32 0.010009766, %v1188_v15  ;;  %v1193_v18 = vmul.f32 0.010009766, %v1189_v16  ;;  %vm1190_vm4 = vcmp.gt.f32.partialorder %v1188_v15, 0.0  ;;  %vm1191_vm5 = vcmp.gt.f32.partialorder %v1189_v16, 0.0 }
 0x1ad   :  { %vm1195_vm6 = vmpackc.low %vm1191_vm5, %vm1190_vm4 }
 0x1ae   :  { %v1194_v58 = vpack.c.bf16 %v1193_v18, %v1192_v17 }
 0x1b0   :  { %v1196_v19 = vsel %vm1195_vm6, %v1187_v14, %v1194_v58 }
 0x1b1   :  { %v1230_v20 = vunpack.c.l.b16 %v1196_v19  ;;  %v1231_v21 = vunpack.c.h.b16 %v1196_v19 }
 0x1b3   :  { %v1232_v22 = vpack.c.b16 %v1230_v20, %v1230_v20  ;;  %v1233_v23 = vpack.c.b16 %v1231_v21, %v1231_v21 }
 0x1b5   :  { %1340 = vmatmul.bf16.vlgmr.msra.gmra.mxu1 %v1232_v22  ;;  %1353 = vmatmul.bf16.vlgmr.msra.gmra.mxu3 %v1233_v23 }
 0x232   :  { %v1341_v25 = vpop.f32.mrf.mxu1 }
 0x238   :  { %v1354_v28 = vpop.f32.mrf.mxu3 }
 0x239   :  { %v1355_v29 = vadd.f32 %v1354_v28, %v1341_v25 }
 0x23a   :  { %v1343_v31 = vpop.f32.mrf.mxu1 }
 0x23b   :  { %v1358_v9 = vpack.c.bf16 %v1355_v29, %v1355_v29 }
 0x23d   :  { %v1364_v34 = vunpack.c.l.bf16 %v1358_v9 }
 0x23f   :  { %v1366_v36 = vadd.f32 %v1365_v32, %v1364_v34 }
 0x240   :  { %v1356_v8 = vpop.f32.mrf.mxu3 }
 0x241   :  { %v1367_v38 = vpack.c.bf16 %v1366_v36, %v1366_v36 }
 0x243   :  { %v1368_v39 = vunpack.c.l.bf16 %v1367_v38 }
 0x245   :  { %v1370_v40 = vmul.f32 0.010009766, %v1368_v39  ;;  %vm1369_vm7 = vcmp.gt.f32.partialorder %v1368_v39, 0.0 }
 0x246   :  { %vm1372_vm8 = vmpackc.low %vm1369_vm7, %vm1369_vm7 }
 0x247   :  { %v1371_v41 = vpack.c.bf16 %v1370_v40, %v1370_v40 }
 0x249   :  { %v1373_v42 = vsel %vm1372_vm8, %v1367_v38, %v1371_v41 }
 0x24a   :  { %1374 = vst [vmem:[#allocation11] sm:$0xf] %v1373_v42 }
 0x24b   :  { %1385 = dma.vmem_to_hbm [thread:$0]  %s1381_s29, 64, %s1383_s6, [#allocation4]  }
 0x24c   :  { %2286 = dma.done.wait [#allocation4], 64  }
 0x24d   :  { %2287 = vsyncadd [#allocation4], 4294967232 }
 0x24e   :  { %1390 = vsyncpa [#allocation3], 1 }
 0x24f   :  { %1391 = vsyncpa [#allocation6], 1 }
 0x250   :  { %1392 = vsyncpa [#allocation9], 1 }
 0x251   :  { %1393 = vsyncpa [#allocation4], 1 }

</bundles_post_ra>
